<compile_context>
chip_gen: v6e
topology: v6e:2x2x1
jax: 0.10.0
libtpu: 0.0.40
codegen_flags: <defaults>
</compile_context>

<pallas_src>
import functools

import jax
import jax.numpy as jnp
from jax.experimental import pallas as pl
from jax.experimental.pallas import tpu as pltpu


def _mamba_kernel(eps, x_ref, wn_ref, win_ref, cw_ref, cb_ref, wxp_ref,
                  wdt_ref, dtb_ref, alog_ref, d_ref, wout_ref, o_ref,
                  dt_s, xs_s, b_s, c_s, y_s, h_s):
    L = x_ref.shape[1]
    d_state, d_inner = alog_ref.shape
    d_conv = cw_ref.shape[0]
    dt_rank = wdt_ref.shape[0]

    x = x_ref[0].astype(jnp.float32)                          # (L, d_model)

    # ---- RMSNorm (norm1) ------------------------------------------------------
    ms = jnp.mean(x * x, axis=-1, keepdims=True)
    xn = x * jax.lax.rsqrt(ms + eps) * wn_ref[...]

    # ---- in_proj (bias=False) -> split into (x1, z) ---------------------------
    xz = jnp.dot(xn, win_ref[...], preferred_element_type=jnp.float32)
    x1 = xz[:, :d_inner]
    z = xz[:, d_inner:]

    # ---- causal depthwise conv1d (padding=d_conv-1, sliced to L) + SiLU -------
    xp = jnp.concatenate(
        [jnp.zeros((d_conv - 1, d_inner), jnp.float32), x1], axis=0)
    acc = cb_ref[...].astype(jnp.float32)                      # (1, d_inner) broadcast
    for k in range(d_conv):                                    # d_conv is tiny & static
        acc = acc + xp[k:k + L, :] * cw_ref[k:k + 1, :]
    xc = jax.nn.silu(acc)                                      # (L, d_inner)

    # ---- x_proj -> (delta_low_rank, B, C) -------------------------------------
    dbc = jnp.dot(xc, wxp_ref[...], preferred_element_type=jnp.float32)
    dr = dbc[:, :dt_rank]
    Bm = dbc[:, dt_rank:dt_rank + d_state]                     # (L, d_state)
    Cm = dbc[:, dt_rank + d_state:]                            # (L, d_state)

    # ---- dt_proj + softplus ----------------------------------------------------
    delta = jax.nn.softplus(
        jnp.dot(dr, wdt_ref[...], preferred_element_type=jnp.float32)
        + dtb_ref[...])                                        # (L, d_inner)

    # ---- stage per-timestep operands in VMEM for dynamic row slicing ----------
    dt_s[...] = delta
    xs_s[...] = xc
    b_s[...] = Bm
    c_s[...] = Cm
    h_s[...] = jnp.zeros_like(h_s)

    A_T = -jnp.exp(alog_ref[...])                              # (d_state, d_inner)

    # ---- sequential selective scan over time (h state in VMEM scratch) --------
    @pl.loop(0, L)
    def _(t):
        dt_row = dt_s[pl.ds(t, 1), :]                          # (1, d_inner)
        x_row = xs_s[pl.ds(t, 1), :]                           # (1, d_inner)
        b_row = b_s[pl.ds(t, 1), :]                            # (1, d_state)
        c_row = c_s[pl.ds(t, 1), :]                            # (1, d_state)

        dA = jnp.exp(dt_row * A_T)                             # (d_state, d_inner)
        # rank-1 update B_t^T (delta_t * x_t) expressed as a K=1 matmul (outer product)
        bx = jax.lax.dot_general(
            b_row, dt_row * x_row, (((0,), (0,)), ((), ())),
            preferred_element_type=jnp.float32)                # (d_state, d_inner)
        h_new = dA * h_s[...] + bx
        h_s[...] = h_new
        # y_t = C_t . h_t
        y_s[pl.ds(t, 1), :] = jnp.dot(c_row, h_new,
                                      preferred_element_type=jnp.float32)

    # ---- D skip, gate with SiLU(z), out_proj (bias=False), residual ------------
    y = y_s[...] + xc * d_ref[...]
    y = y * jax.nn.silu(z)
    out = jnp.dot(y, wout_ref[...], preferred_element_type=jnp.float32)
    o_ref[0] = (out + x).astype(o_ref.dtype)


def mamba_model_forward(x, rms_w, w_in, conv_w, conv_b, w_xproj, w_dt, dt_b,
                        A_log_T, D, w_out, *, eps=1e-5):
    """Fused MambaModel forward.

    x:        [B, L, d_model]
    rms_w:    [1, d_model]                 RMSNorm weight
    w_in:     [d_model, 2*d_inner]         in_proj weight (transposed, bias=False)
    conv_w:   [d_conv, d_inner]            depthwise conv weight (kernel-major)
    conv_b:   [1, d_inner]
    w_xproj:  [d_inner, dt_rank+2*d_state]
    w_dt:     [dt_rank, d_inner]
    dt_b:     [1, d_inner]
    A_log_T:  [d_state, d_inner]           transpose of the module's A_log
    D:        [1, d_inner]
    w_out:    [d_inner, d_model]           out_proj weight (transposed, bias=False)
    """
    B, L, d_model = x.shape
    d_state, d_inner = A_log_T.shape
    d_conv = conv_w.shape[0]
    dt_rank = w_dt.shape[0]
    assert w_xproj.shape[1] == dt_rank + 2 * d_state

    # Advisory cost hint for XLA scheduling around the fused block.
    M = B * L
    flops = (2 * M * (d_model * 2 * d_inner
                      + d_inner * (dt_rank + 2 * d_state)
                      + dt_rank * d_inner
                      + d_inner * d_model
                      + d_inner * d_conv)
             + 8 * M * d_inner * d_state)
    transcendentals = M * d_inner * (d_state + 4)
    weight_bytes = sum(int(w.size) * w.dtype.itemsize
                       for w in (rms_w, w_in, conv_w, conv_b, w_xproj, w_dt,
                                 dt_b, A_log_T, D, w_out))
    bytes_accessed = 2 * int(x.size) * x.dtype.itemsize + B * weight_bytes

    kernel = functools.partial(_mamba_kernel, eps)

    def wspec(a):  # full-array (constant) weight block
        return pl.BlockSpec(a.shape, lambda b: (0, 0))

    out = pl.pallas_call(
        kernel,
        out_shape=jax.ShapeDtypeStruct((B, L, d_model), x.dtype),
        grid_spec=pltpu.PrefetchScalarGridSpec(
            num_scalar_prefetch=0,
            grid=(B,),
            in_specs=[
                pl.BlockSpec((1, L, d_model), lambda b: (b, 0, 0)),   # x (per sequence)
                wspec(rms_w), wspec(w_in), wspec(conv_w), wspec(conv_b),
                wspec(w_xproj), wspec(w_dt), wspec(dt_b), wspec(A_log_T),
                wspec(D), wspec(w_out),
            ],
            out_specs=pl.BlockSpec((1, L, d_model), lambda b: (b, 0, 0)),
            scratch_shapes=[
                pltpu.VMEM((L, d_inner), jnp.float32),   # delta
                pltpu.VMEM((L, d_inner), jnp.float32),   # silu(conv(x))
                pltpu.VMEM((L, d_state), jnp.float32),   # B
                pltpu.VMEM((L, d_state), jnp.float32),   # C
                pltpu.VMEM((L, d_inner), jnp.float32),   # y
                pltpu.VMEM((d_state, d_inner), jnp.float32),  # h state carry
            ],
        ),
        compiler_params=pltpu.CompilerParams(
            dimension_semantics=("parallel",),
            vmem_limit_bytes=32 * 1024 * 1024,
        ),
        cost_estimate=pl.CostEstimate(
            flops=int(flops),
            transcendentals=int(transcendentals),
            bytes_accessed=int(bytes_accessed),
        ),
    )(x, rms_w, w_in, conv_w, conv_b, w_xproj, w_dt, dt_b, A_log_T, D, w_out)
    return out


def _reference(x, rms_w, w_in, conv_w, conv_b, w_xproj, w_dt, dt_b,
               A_log_T, D, w_out, eps=1e-5):
    """Pure-JAX reference matching the PyTorch module semantics."""
    P = jax.lax.Precision.HIGHEST
    Bsz, L, _ = x.shape
    d_state, d_inner = A_log_T.shape
    d_conv = conv_w.shape[0]
    dt_rank = w_dt.shape[0]

    xn = x * jax.lax.rsqrt(jnp.mean(x * x, axis=-1, keepdims=True) + eps) * rms_w[0]
    xz = jnp.dot(xn, w_in, precision=P)
    x1, z = xz[..., :d_inner], xz[..., d_inner:]

    xp = jnp.pad(x1, ((0, 0), (d_conv - 1, 0), (0, 0)))
    conv = conv_b[0]
    for k in range(d_conv):
        conv = conv + xp[:, k:k + L, :] * conv_w[k]
    xc = jax.nn.silu(conv)

    dbc = jnp.dot(xc, w_xproj, precision=P)
    dr = dbc[..., :dt_rank]
    Bm = dbc[..., dt_rank:dt_rank + d_state]
    Cm = dbc[..., dt_rank + d_state:]
    delta = jax.nn.softplus(jnp.dot(dr, w_dt, precision=P) + dt_b[0])

    A_T = -jnp.exp(A_log_T)                                       # (d_state, d_inner)
    dA = jnp.exp(delta[:, :, None, :] * A_T[None, None])          # (B, L, n, d)
    bx = Bm[..., None] * (delta * xc)[:, :, None, :]              # (B, L, n, d)

    def step(h, inp):
        dA_t, bx_t, C_t = inp
        h = dA_t * h + bx_t
        y_t = jnp.sum(h * C_t[..., None], axis=1)                 # (B, d_inner)
        return h, y_t

    h0 = jnp.zeros((Bsz, d_state, d_inner), jnp.float32)
    _, ys = jax.lax.scan(step, h0, (dA.transpose(1, 0, 2, 3),
                                    bx.transpose(1, 0, 2, 3),
                                    Cm.transpose(1, 0, 2)))
    y = ys.transpose(1, 0, 2)                                     # (B, L, d_inner)
    y = y + xc * D[0]
    y = y * jax.nn.silu(z)
    return jnp.dot(y, w_out, precision=P) + x


if __name__ == "__main__":
    # Small Mamba config: d_model=32, expand=2 -> d_inner=64, d_state=16, d_conv=4,
    # dt_rank=ceil(d_model/16)=2, bias=False, conv_bias=True.
    B, L = 2, 8
    d_model, d_inner, d_state, d_conv, dt_rank = 32, 64, 16, 4, 2

    key = jax.random.PRNGKey(0)
    ks = jax.random.split(key, 8)

    x = jax.random.normal(ks[0], (B, L, d_model), jnp.float32)
    rms_w = jnp.ones((1, d_model), jnp.float32)                   # RMSNorm init
    w_in = jax.random.uniform(ks[1], (d_model, 2 * d_inner), jnp.float32,
                              -1.0, 1.0) / jnp.sqrt(d_model)
    conv_w = jax.random.uniform(ks[2], (d_conv, d_inner), jnp.float32,
                                -1.0, 1.0) / jnp.sqrt(d_conv)
    conv_b = jax.random.uniform(ks[3], (1, d_inner), jnp.float32, -0.1, 0.1)
    w_xproj = jax.random.uniform(ks[4], (d_inner, dt_rank + 2 * d_state),
                                 jnp.float32, -1.0, 1.0) / jnp.sqrt(d_inner)
    dt_std = dt_rank ** -0.5
    w_dt = jax.random.uniform(ks[5], (dt_rank, d_inner), jnp.float32,
                              -dt_std, dt_std)
    # dt bias init as in the module: inverse-softplus of dt ~ U(log 1e-3, log 1e-1)
    dt = jnp.exp(jax.random.uniform(ks[6], (d_inner,), jnp.float32)
                 * (jnp.log(0.1) - jnp.log(0.001)) + jnp.log(0.001))
    dt = jnp.maximum(dt, 1e-4)
    dt_b = (dt + jnp.log(-jnp.expm1(-dt))).reshape(1, d_inner)
    # A_log init = log(arange(1..d_state)) repeated per channel (stored transposed)
    A_log_T = jnp.log(jnp.tile(
        jnp.arange(1, d_state + 1, dtype=jnp.float32)[:, None], (1, d_inner)))
    Dp = jnp.ones((1, d_inner), jnp.float32)
    w_out = jax.random.uniform(ks[7], (d_inner, d_model), jnp.float32,
                               -1.0, 1.0) / jnp.sqrt(d_inner)

    out = mamba_model_forward(x, rms_w, w_in, conv_w, conv_b, w_xproj, w_dt,
                              dt_b, A_log_T, Dp, w_out)
    out = jax.block_until_ready(out)

    ref = _reference(x, rms_w, w_in, conv_w, conv_b, w_xproj, w_dt, dt_b,
                     A_log_T, Dp, w_out)
    assert out.shape == (B, L, d_model)
    err = float(jnp.max(jnp.abs(out - ref)))
    assert bool(jnp.allclose(out, ref, atol=1e-3, rtol=1e-3)), f"max abs err {err}"

    print("KERNEL_OK")
</pallas_src>

<mosaic_0001>
module attributes {stable_mosaic.version = 11 : i64} {
  func.func @_mamba_kernel(%arg0: i32, %arg1: memref<1x8x32xf32, #tpu.memory_space<vmem>>, %arg2: memref<1x32xf32, #tpu.memory_space<vmem>>, %arg3: memref<32x128xf32, #tpu.memory_space<vmem>>, %arg4: memref<4x64xf32, #tpu.memory_space<vmem>>, %arg5: memref<1x64xf32, #tpu.memory_space<vmem>>, %arg6: memref<64x34xf32, #tpu.memory_space<vmem>>, %arg7: memref<2x64xf32, #tpu.memory_space<vmem>>, %arg8: memref<1x64xf32, #tpu.memory_space<vmem>>, %arg9: memref<16x64xf32, #tpu.memory_space<vmem>>, %arg10: memref<1x64xf32, #tpu.memory_space<vmem>>, %arg11: memref<64x32xf32, #tpu.memory_space<vmem>>, %arg12: memref<1x8x32xf32, #tpu.memory_space<vmem>>, %arg13: memref<8x64xf32, #tpu.memory_space<vmem>>, %arg14: memref<8x64xf32, #tpu.memory_space<vmem>>, %arg15: memref<8x16xf32, #tpu.memory_space<vmem>>, %arg16: memref<8x16xf32, #tpu.memory_space<vmem>>, %arg17: memref<8x64xf32, #tpu.memory_space<vmem>>, %arg18: memref<16x64xf32, #tpu.memory_space<vmem>>) attributes {dimension_semantics = [#tpu.dimension_semantics<parallel>], iteration_bounds = array<i64: 2>, scalar_prefetch = 0 : i64, scratch_operands = 6 : i64, tpu.core_type = #tpu.core_type<tc>, window_params = [{transform_indices = @transform_0, window_bounds = array<i64: 1, 8, 32>}, {pipeline_mode = #tpu.pipeline_mode<synchronous>, transform_indices = @transform_1, window_bounds = array<i64: 1, 32>}, {pipeline_mode = #tpu.pipeline_mode<synchronous>, transform_indices = @transform_2, window_bounds = array<i64: 32, 128>}, {pipeline_mode = #tpu.pipeline_mode<synchronous>, transform_indices = @transform_3, window_bounds = array<i64: 4, 64>}, {pipeline_mode = #tpu.pipeline_mode<synchronous>, transform_indices = @transform_4, window_bounds = array<i64: 1, 64>}, {pipeline_mode = #tpu.pipeline_mode<synchronous>, transform_indices = @transform_5, window_bounds = array<i64: 64, 34>}, {pipeline_mode = #tpu.pipeline_mode<synchronous>, transform_indices = @transform_6, window_bounds = array<i64: 2, 64>}, {pipeline_mode = #tpu.pipeline_mode<synchronous>, transform_indices = @transform_7, window_bounds = array<i64: 1, 64>}, {pipeline_mode = #tpu.pipeline_mode<synchronous>, transform_indices = @transform_8, window_bounds = array<i64: 16, 64>}, {pipeline_mode = #tpu.pipeline_mode<synchronous>, transform_indices = @transform_9, window_bounds = array<i64: 1, 64>}, {pipeline_mode = #tpu.pipeline_mode<synchronous>, transform_indices = @transform_10, window_bounds = array<i64: 64, 32>}, {transform_indices = @transform_11, window_bounds = array<i64: 1, 8, 32>}]} {
    %c0 = arith.constant 0 : index
    %c0_0 = arith.constant 0 : index
    %c0_1 = arith.constant 0 : index
    %0 = vector.load %arg1[%c0, %c0_0, %c0_1] : memref<1x8x32xf32, #tpu.memory_space<vmem>>, vector<1x8x32xf32>
    %1 = vector.shape_cast %0 : vector<1x8x32xf32> to vector<8x32xf32>
    %2 = arith.mulf %1, %1 : vector<8x32xf32>
    %cst = arith.constant dense<0.000000e+00> : vector<8xf32>
    %3 = vector.multi_reduction <add>, %2, %cst [1] : vector<8x32xf32> to vector<8xf32>
    %4 = vector.shape_cast %3 : vector<8xf32> to vector<8x1xf32>
    %cst_2 = arith.constant 3.200000e+01 : f32
    %5 = vector.broadcast %cst_2 : f32 to vector<8x1xf32>
    %6 = arith.divf %4, %5 : vector<8x1xf32>
    %cst_3 = arith.constant 9.99999974E-6 : f32
    %7 = vector.broadcast %cst_3 : f32 to vector<8x1xf32>
    %8 = arith.addf %6, %7 : vector<8x1xf32>
    %9 = math.rsqrt %8 : vector<8x1xf32>
    %10 = vector.broadcast %9 : vector<8x1xf32> to vector<8x32xf32>
    %11 = arith.mulf %1, %10 : vector<8x32xf32>
    %c0_4 = arith.constant 0 : index
    %c0_5 = arith.constant 0 : index
    %12 = vector.load %arg2[%c0_4, %c0_5] : memref<1x32xf32, #tpu.memory_space<vmem>>, vector<1x32xf32>
    %13 = vector.broadcast %12 : vector<1x32xf32> to vector<8x32xf32>
    %14 = arith.mulf %11, %13 : vector<8x32xf32>
    %c0_6 = arith.constant 0 : index
    %c0_7 = arith.constant 0 : index
    %15 = vector.load %arg3[%c0_6, %c0_7] : memref<32x128xf32, #tpu.memory_space<vmem>>, vector<32x128xf32>
    %cst_8 = arith.constant dense<0.000000e+00> : vector<8x128xf32>
    %16 = tpu.matmul %14, %15, %cst_8 {dimension_numbers = #tpu.dot_dimension_numbers<[1], [0], [0], [1], [0, 0, 1, 1], [], []>} : vector<8x32xf32>, vector<32x128xf32>, vector<8x128xf32> -> vector<8x128xf32>
    %17 = vector.extract_strided_slice %16 {offsets = [0, 0], sizes = [8, 64], strides = [1, 1]} : vector<8x128xf32> to vector<8x64xf32>
    %18 = vector.extract_strided_slice %16 {offsets = [0, 64], sizes = [8, 64], strides = [1, 1]} : vector<8x128xf32> to vector<8x64xf32>
    %cst_9 = arith.constant 0.000000e+00 : f32
    %19 = vector.broadcast %cst_9 : f32 to vector<3x64xf32>
    %20 = tpu.concatenate %19, %17 in 0 : vector<3x64xf32>, vector<8x64xf32> -> vector<11x64xf32>
    %c0_10 = arith.constant 0 : index
    %c0_11 = arith.constant 0 : index
    %21 = vector.load %arg5[%c0_10, %c0_11] : memref<1x64xf32, #tpu.memory_space<vmem>>, vector<1x64xf32>
    %22 = vector.extract_strided_slice %20 {offsets = [0, 0], sizes = [8, 64], strides = [1, 1]} : vector<11x64xf32> to vector<8x64xf32>
    %c0_12 = arith.constant 0 : index
    %c0_13 = arith.constant 0 : index
    %23 = vector.load %arg4[%c0_12, %c0_13] : memref<4x64xf32, #tpu.memory_space<vmem>>, vector<1x64xf32>
    %24 = vector.broadcast %23 : vector<1x64xf32> to vector<8x64xf32>
    %25 = arith.mulf %22, %24 : vector<8x64xf32>
    %26 = vector.broadcast %21 : vector<1x64xf32> to vector<8x64xf32>
    %27 = arith.addf %26, %25 : vector<8x64xf32>
    %28 = vector.extract_strided_slice %20 {offsets = [1, 0], sizes = [8, 64], strides = [1, 1]} : vector<11x64xf32> to vector<8x64xf32>
    %c1 = arith.constant 1 : index
    %c0_14 = arith.constant 0 : index
    %29 = vector.load %arg4[%c1, %c0_14] : memref<4x64xf32, #tpu.memory_space<vmem>>, vector<1x64xf32>
    %30 = vector.broadcast %29 : vector<1x64xf32> to vector<8x64xf32>
    %31 = arith.mulf %28, %30 : vector<8x64xf32>
    %32 = arith.addf %27, %31 : vector<8x64xf32>
    %33 = vector.extract_strided_slice %20 {offsets = [2, 0], sizes = [8, 64], strides = [1, 1]} : vector<11x64xf32> to vector<8x64xf32>
    %c2 = arith.constant 2 : index
    %c0_15 = arith.constant 0 : index
    %34 = vector.load %arg4[%c2, %c0_15] : memref<4x64xf32, #tpu.memory_space<vmem>>, vector<1x64xf32>
    %35 = vector.broadcast %34 : vector<1x64xf32> to vector<8x64xf32>
    %36 = arith.mulf %33, %35 : vector<8x64xf32>
    %37 = arith.addf %32, %36 : vector<8x64xf32>
    %38 = vector.extract_strided_slice %20 {offsets = [3, 0], sizes = [8, 64], strides = [1, 1]} : vector<11x64xf32> to vector<8x64xf32>
    %c3 = arith.constant 3 : index
    %c0_16 = arith.constant 0 : index
    %39 = vector.load %arg4[%c3, %c0_16] : memref<4x64xf32, #tpu.memory_space<vmem>>, vector<1x64xf32>
    %40 = vector.broadcast %39 : vector<1x64xf32> to vector<8x64xf32>
    %41 = arith.mulf %38, %40 : vector<8x64xf32>
    %42 = arith.addf %37, %41 : vector<8x64xf32>
    %43 = arith.negf %42 : vector<8x64xf32>
    %44 = math.exp %43 : vector<8x64xf32>
    %cst_17 = arith.constant 1.000000e+00 : f32
    %45 = vector.broadcast %cst_17 : f32 to vector<8x64xf32>
    %46 = arith.addf %45, %44 : vector<8x64xf32>
    %47 = arith.divf %45, %46 : vector<8x64xf32>
    %48 = arith.mulf %42, %47 : vector<8x64xf32>
    %c0_18 = arith.constant 0 : index
    %c0_19 = arith.constant 0 : index
    %49 = vector.load %arg6[%c0_18, %c0_19] : memref<64x34xf32, #tpu.memory_space<vmem>>, vector<64x34xf32>
    %cst_20 = arith.constant dense<0.000000e+00> : vector<8x34xf32>
    %50 = tpu.matmul %48, %49, %cst_20 {dimension_numbers = #tpu.dot_dimension_numbers<[1], [0], [0], [1], [0, 0, 1, 1], [], []>} : vector<8x64xf32>, vector<64x34xf32>, vector<8x34xf32> -> vector<8x34xf32>
    %51 = vector.extract_strided_slice %50 {offsets = [0, 0], sizes = [8, 2], strides = [1, 1]} : vector<8x34xf32> to vector<8x2xf32>
    %52 = vector.extract_strided_slice %50 {offsets = [0, 2], sizes = [8, 16], strides = [1, 1]} : vector<8x34xf32> to vector<8x16xf32>
    %53 = vector.extract_strided_slice %50 {offsets = [0, 18], sizes = [8, 16], strides = [1, 1]} : vector<8x34xf32> to vector<8x16xf32>
    %c0_21 = arith.constant 0 : index
    %c0_22 = arith.constant 0 : index
    %54 = vector.load %arg7[%c0_21, %c0_22] : memref<2x64xf32, #tpu.memory_space<vmem>>, vector<2x64xf32>
    %cst_23 = arith.constant dense<0.000000e+00> : vector<8x64xf32>
    %55 = tpu.matmul %51, %54, %cst_23 {dimension_numbers = #tpu.dot_dimension_numbers<[1], [0], [0], [1], [0, 0, 1, 1], [], []>} : vector<8x2xf32>, vector<2x64xf32>, vector<8x64xf32> -> vector<8x64xf32>
    %c0_24 = arith.constant 0 : index
    %c0_25 = arith.constant 0 : index
    %56 = vector.load %arg8[%c0_24, %c0_25] : memref<1x64xf32, #tpu.memory_space<vmem>>, vector<1x64xf32>
    %57 = vector.broadcast %56 : vector<1x64xf32> to vector<8x64xf32>
    %58 = arith.addf %55, %57 : vector<8x64xf32>
    %cst_26 = arith.constant 0.000000e+00 : f32
    %59 = vector.broadcast %cst_26 : f32 to vector<8x64xf32>
    %60 = arith.maximumf %58, %59 : vector<8x64xf32>
    %61 = vector.broadcast %cst_26 : f32 to vector<8x64xf32>
    %62 = arith.subf %58, %61 : vector<8x64xf32>
    %63 = arith.cmpf one, %62, %62 : vector<8x64xf32>
    %64 = vector.broadcast %cst_26 : f32 to vector<8x64xf32>
    %65 = arith.addf %58, %64 : vector<8x64xf32>
    %66 = math.absf %62 : vector<8x64xf32>
    %cst_27 = arith.constant 0.000000e+00 : f32
    %67 = vector.broadcast %cst_27 : f32 to vector<8x64xf32>
    %68 = arith.subf %67, %66 : vector<8x64xf32>
    %69 = math.exp %68 : vector<8x64xf32>
    %70 = math.log1p %69 : vector<8x64xf32>
    %71 = arith.addf %60, %70 : vector<8x64xf32>
    %72 = arith.select %63, %65, %71 : vector<8x64xi1>, vector<8x64xf32>
    %c0_28 = arith.constant 0 : index
    %c0_29 = arith.constant 0 : index
    %73 = vector.load %arg13[%c0_28, %c0_29] : memref<8x64xf32, #tpu.memory_space<vmem>>, vector<8x64xf32>
    tpu.vector_store %arg13[%c0_28, %c0_29], %72 {strides = array<i32>} : memref<8x64xf32, #tpu.memory_space<vmem>>, vector<8x64xf32>,
    %c0_30 = arith.constant 0 : index
    %c0_31 = arith.constant 0 : index
    %74 = vector.load %arg14[%c0_30, %c0_31] : memref<8x64xf32, #tpu.memory_space<vmem>>, vector<8x64xf32>
    tpu.vector_store %arg14[%c0_30, %c0_31], %48 {strides = array<i32>} : memref<8x64xf32, #tpu.memory_space<vmem>>, vector<8x64xf32>,
    %c0_32 = arith.constant 0 : index
    %c0_33 = arith.constant 0 : index
    %75 = vector.load %arg15[%c0_32, %c0_33] : memref<8x16xf32, #tpu.memory_space<vmem>>, vector<8x16xf32>
    tpu.vector_store %arg15[%c0_32, %c0_33], %52 {strides = array<i32>} : memref<8x16xf32, #tpu.memory_space<vmem>>, vector<8x16xf32>,
    %c0_34 = arith.constant 0 : index
    %c0_35 = arith.constant 0 : index
    %76 = vector.load %arg16[%c0_34, %c0_35] : memref<8x16xf32, #tpu.memory_space<vmem>>, vector<8x16xf32>
    tpu.vector_store %arg16[%c0_34, %c0_35], %53 {strides = array<i32>} : memref<8x16xf32, #tpu.memory_space<vmem>>, vector<8x16xf32>,
    %cst_36 = arith.constant 0.000000e+00 : f32
    %77 = vector.broadcast %cst_36 : f32 to vector<16x64xf32>
    %c0_37 = arith.constant 0 : index
    %c0_38 = arith.constant 0 : index
    %78 = vector.load %arg18[%c0_37, %c0_38] : memref<16x64xf32, #tpu.memory_space<vmem>>, vector<16x64xf32>
    tpu.vector_store %arg18[%c0_37, %c0_38], %77 {strides = array<i32>} : memref<16x64xf32, #tpu.memory_space<vmem>>, vector<16x64xf32>,
    %c0_39 = arith.constant 0 : index
    %c0_40 = arith.constant 0 : index
    %79 = vector.load %arg9[%c0_39, %c0_40] : memref<16x64xf32, #tpu.memory_space<vmem>>, vector<16x64xf32>
    %80 = math.exp %79 : vector<16x64xf32>
    %cst_41 = arith.constant 0.000000e+00 : f32
    %81 = vector.broadcast %cst_41 : f32 to vector<16x64xf32>
    %82 = arith.subf %81, %80 : vector<16x64xf32>
    %c0_i32 = arith.constant 0 : i32
    %c8_i32 = arith.constant 8 : i32
    %83 = arith.addi %c0_i32, %c8_i32 : i32
    %c1_i32 = arith.constant 1 : i32
    scf.for %arg19 = %c0_i32 to %83 step %c1_i32  : i32 {
      %c1_i32_54 = arith.constant 1 : i32
      %102 = arith.muli %arg19, %c1_i32_54 : i32
      %c0_i32_55 = arith.constant 0 : i32
      %103 = arith.addi %c0_i32_55, %102 : i32
      %104 = arith.index_cast %103 : i32 to index
      %c0_56 = arith.constant 0 : index
      %105 = vector.load %arg13[%104, %c0_56] : memref<8x64xf32, #tpu.memory_space<vmem>>, vector<1x64xf32>
      %106 = arith.index_cast %103 : i32 to index
      %c0_57 = arith.constant 0 : index
      %107 = vector.load %arg14[%106, %c0_57] : memref<8x64xf32, #tpu.memory_space<vmem>>, vector<1x64xf32>
      %108 = arith.index_cast %103 : i32 to index
      %c0_58 = arith.constant 0 : index
      %109 = vector.load %arg15[%108, %c0_58] : memref<8x16xf32, #tpu.memory_space<vmem>>, vector<1x16xf32>
      %110 = arith.index_cast %103 : i32 to index
      %c0_59 = arith.constant 0 : index
      %111 = vector.load %arg16[%110, %c0_59] : memref<8x16xf32, #tpu.memory_space<vmem>>, vector<1x16xf32>
      %112 = vector.broadcast %105 : vector<1x64xf32> to vector<16x64xf32>
      %113 = arith.mulf %112, %82 : vector<16x64xf32>
      %114 = math.exp %113 : vector<16x64xf32>
      %115 = arith.mulf %105, %107 : vector<1x64xf32>
      %cst_60 = arith.constant dense<0.000000e+00> : vector<16x64xf32>
      %116 = tpu.matmul %109, %115, %cst_60 {dimension_numbers = #tpu.dot_dimension_numbers<[0], [0], [1], [1], [0, 1, 1, 1], [], []>} : vector<1x16xf32>, vector<1x64xf32>, vector<16x64xf32> -> vector<16x64xf32>
      %c0_61 = arith.constant 0 : index
      %c0_62 = arith.constant 0 : index
      %117 = vector.load %arg18[%c0_61, %c0_62] : memref<16x64xf32, #tpu.memory_space<vmem>>, vector<16x64xf32>
      %118 = arith.mulf %114, %117 : vector<16x64xf32>
      %119 = arith.addf %118, %116 : vector<16x64xf32>
      %c0_63 = arith.constant 0 : index
      %c0_64 = arith.constant 0 : index
      %120 = vector.load %arg18[%c0_63, %c0_64] : memref<16x64xf32, #tpu.memory_space<vmem>>, vector<16x64xf32>
      tpu.vector_store %arg18[%c0_63, %c0_64], %119 {strides = array<i32>} : memref<16x64xf32, #tpu.memory_space<vmem>>, vector<16x64xf32>,
      %cst_65 = arith.constant dense<0.000000e+00> : vector<1x64xf32>
      %121 = tpu.matmul %111, %119, %cst_65 {dimension_numbers = #tpu.dot_dimension_numbers<[1], [0], [0], [1], [0, 0, 1, 1], [], []>} : vector<1x16xf32>, vector<16x64xf32>, vector<1x64xf32> -> vector<1x64xf32>
      %122 = arith.index_cast %103 : i32 to index
      %c0_66 = arith.constant 0 : index
      %123 = vector.load %arg17[%122, %c0_66] : memref<8x64xf32, #tpu.memory_space<vmem>>, vector<1x64xf32>
      tpu.vector_store %arg17[%122, %c0_66], %121 {strides = array<i32>} : memref<8x64xf32, #tpu.memory_space<vmem>>, vector<1x64xf32>,
    }
    %c8_i32_42 = arith.constant 8 : i32
    %c0_43 = arith.constant 0 : index
    %c0_44 = arith.constant 0 : index
    %84 = vector.load %arg17[%c0_43, %c0_44] : memref<8x64xf32, #tpu.memory_space<vmem>>, vector<8x64xf32>
    %c0_45 = arith.constant 0 : index
    %c0_46 = arith.constant 0 : index
    %85 = vector.load %arg10[%c0_45, %c0_46] : memref<1x64xf32, #tpu.memory_space<vmem>>, vector<1x64xf32>
    %86 = vector.broadcast %85 : vector<1x64xf32> to vector<8x64xf32>
    %87 = arith.mulf %48, %86 : vector<8x64xf32>
    %88 = arith.addf %84, %87 : vector<8x64xf32>
    %89 = arith.negf %18 : vector<8x64xf32>
    %90 = math.exp %89 : vector<8x64xf32>
    %cst_47 = arith.constant 1.000000e+00 : f32
    %91 = vector.broadcast %cst_47 : f32 to vector<8x64xf32>
    %92 = arith.addf %91, %90 : vector<8x64xf32>
    %93 = arith.divf %91, %92 : vector<8x64xf32>
    %94 = arith.mulf %18, %93 : vector<8x64xf32>
    %95 = arith.mulf %88, %94 : vector<8x64xf32>
    %c0_48 = arith.constant 0 : index
    %c0_49 = arith.constant 0 : index
    %96 = vector.load %arg11[%c0_48, %c0_49] : memref<64x32xf32, #tpu.memory_space<vmem>>, vector<64x32xf32>
    %cst_50 = arith.constant dense<0.000000e+00> : vector<8x32xf32>
    %97 = tpu.matmul %95, %96, %cst_50 {dimension_numbers = #tpu.dot_dimension_numbers<[1], [0], [0], [1], [0, 0, 1, 1], [], []>} : vector<8x64xf32>, vector<64x32xf32>, vector<8x32xf32> -> vector<8x32xf32>
    %98 = arith.addf %97, %1 : vector<8x32xf32>
    %c0_51 = arith.constant 0 : index
    %c0_52 = arith.constant 0 : index
    %c0_53 = arith.constant 0 : index
    %99 = vector.load %arg12[%c0_51, %c0_52, %c0_53] : memref<1x8x32xf32, #tpu.memory_space<vmem>>, vector<1x8x32xf32>
    %100 = vector.shape_cast %99 : vector<1x8x32xf32> to vector<8x32xf32>
    %101 = vector.shape_cast %98 : vector<8x32xf32> to vector<1x8x32xf32>
    tpu.vector_store %arg12[%c0_51, %c0_52, %c0_53], %101 {strides = array<i32>} : memref<1x8x32xf32, #tpu.memory_space<vmem>>, vector<1x8x32xf32>,
    return
  }
  func.func @transform_0(%arg0: i32) -> (i32, i32, i32) {
    %c0_i32 = arith.constant 0 : i32
    %c0_i32_0 = arith.constant 0 : i32
    %c0_i32_1 = arith.constant 0 : i32
    return %arg0, %c0_i32, %c0_i32_0 : i32, i32, i32
  }
  func.func @transform_1(%arg0: i32) -> (i32, i32) {
    %c0_i32 = arith.constant 0 : i32
    %c0_i32_0 = arith.constant 0 : i32
    %c0_i32_1 = arith.constant 0 : i32
    return %c0_i32, %c0_i32_0 : i32, i32
  }
  func.func @transform_2(%arg0: i32) -> (i32, i32) {
    %c0_i32 = arith.constant 0 : i32
    %c0_i32_0 = arith.constant 0 : i32
    %c0_i32_1 = arith.constant 0 : i32
    return %c0_i32, %c0_i32_0 : i32, i32
  }
  func.func @transform_3(%arg0: i32) -> (i32, i32) {
    %c0_i32 = arith.constant 0 : i32
    %c0_i32_0 = arith.constant 0 : i32
    %c0_i32_1 = arith.constant 0 : i32
    return %c0_i32, %c0_i32_0 : i32, i32
  }
  func.func @transform_4(%arg0: i32) -> (i32, i32) {
    %c0_i32 = arith.constant 0 : i32
    %c0_i32_0 = arith.constant 0 : i32
    %c0_i32_1 = arith.constant 0 : i32
    return %c0_i32, %c0_i32_0 : i32, i32
  }
  func.func @transform_5(%arg0: i32) -> (i32, i32) {
    %c0_i32 = arith.constant 0 : i32
    %c0_i32_0 = arith.constant 0 : i32
    %c0_i32_1 = arith.constant 0 : i32
    return %c0_i32, %c0_i32_0 : i32, i32
  }
  func.func @transform_6(%arg0: i32) -> (i32, i32) {
    %c0_i32 = arith.constant 0 : i32
    %c0_i32_0 = arith.constant 0 : i32
    %c0_i32_1 = arith.constant 0 : i32
    return %c0_i32, %c0_i32_0 : i32, i32
  }
  func.func @transform_7(%arg0: i32) -> (i32, i32) {
    %c0_i32 = arith.constant 0 : i32
    %c0_i32_0 = arith.constant 0 : i32
    %c0_i32_1 = arith.constant 0 : i32
    return %c0_i32, %c0_i32_0 : i32, i32
  }
  func.func @transform_8(%arg0: i32) -> (i32, i32) {
    %c0_i32 = arith.constant 0 : i32
    %c0_i32_0 = arith.constant 0 : i32
    %c0_i32_1 = arith.constant 0 : i32
    return %c0_i32, %c0_i32_0 : i32, i32
  }
  func.func @transform_9(%arg0: i32) -> (i32, i32) {
    %c0_i32 = arith.constant 0 : i32
    %c0_i32_0 = arith.constant 0 : i32
    %c0_i32_1 = arith.constant 0 : i32
    return %c0_i32, %c0_i32_0 : i32, i32
  }
  func.func @transform_10(%arg0: i32) -> (i32, i32) {
    %c0_i32 = arith.constant 0 : i32
    %c0_i32_0 = arith.constant 0 : i32
    %c0_i32_1 = arith.constant 0 : i32
    return %c0_i32, %c0_i32_0 : i32, i32
  }
  func.func @transform_11(%arg0: i32) -> (i32, i32, i32) {
    %c0_i32 = arith.constant 0 : i32
    %c0_i32_0 = arith.constant 0 : i32
    %c0_i32_1 = arith.constant 0 : i32
    return %arg0, %c0_i32, %c0_i32_0 : i32, i32, i32
  }
}

</mosaic_0001>

<bundles_post_ra>
// kernel: tpu_custom_call.1
= control target key start
LH: loop header
LB: loop body
LE: loop exit
PB: predicated region body
PF: predicated region fallthrough
CT: control target
= control target key end

     0   :  { %s1791_s0 = inlined_call_operand.vmem [shape: f32[2,8,32], index: 0, kind: input, shape index: {}]   ;;  %s1792_s1 = inlined_call_operand.vmem [shape: f32[1,32], index: 1, kind: input, shape index: {}]   ;;  %s1793_s2 = inlined_call_operand.vmem [shape: f32[32,128], index: 2, kind: input, shape index: {}]   ;;  %s1794_s3 = inlined_call_operand.vmem [shape: f32[4,64], index: 3, kind: input, shape index: {}]   ;;  %s1795_s4 = inlined_call_operand.vmem [shape: f32[1,64], index: 4, kind: input, shape index: {}]   ;;  %s1796_s5 = inlined_call_operand.vmem [shape: f32[64,34], index: 5, kind: input, shape index: {}]   ;;  %s1797_s6 = inlined_call_operand.vmem [shape: f32[2,64], index: 6, kind: input, shape index: {}]   ;;  %s1798_s7 = inlined_call_operand.vmem [shape: f32[1,64], index: 7, kind: input, shape index: {}]   ;;  %s1799_s8 = inlined_call_operand.vmem [shape: f32[16,64], index: 8, kind: input, shape index: {}]   ;;  %s1800_s9 = inlined_call_operand.vmem [shape: f32[1,64], index: 9, kind: input, shape index: {}]   ;;  %s1801_s10 = inlined_call_operand.vmem [shape: f32[64,32], index: 10, kind: input, shape index: {}]   ;;  %s1802_s11 = inlined_call_operand.hbm [shape: f32[2,8,32], index: 11, kind: output, shape index: {}]  }
   0x1   :  { %1804 = sst [smem:[#allocation11_spill]] %s1791_s0 }
   0x2   :  { %1805 = sst [smem:[#allocation12_spill]] %s1792_s1 }
   0x3   :  { %16 = vsyncpa [#allocation9], 0 }
   0x4   :  { %18 = vsyncpa [#allocation9 + $0x1], 0  ;;  %s1510_s17 = smov 0   ;;  %s1512_s18 = smov 0  }
   0x5   :  { %s1514_s19 = smov 0   ;;  %s1516_s20 = smov 0  }
   0x6 LB: > { %s1531_s21 = sadd.s32 4294967295, %s1436_s20   ;;  %s1170_s22 = sadd.s32 4294967294, %s1436_s20   ;;  %s1436_s20 = sphi %s1516_s20, %s1814_s20   ;;  %s1432_s19 = sphi %s1514_s19, %s1813_s19   ;;  %s1428_s18 = sphi %s1512_s18, %s1812_s18   ;;  %s1424_s17 = sphi %s1510_s17, %s1811_s17  }
   0x7   : > { %s1535_s23 = sadd.s32 1, %s1436_s20   ;;  %s267_s24 = sadd.s32 1, %s1432_s19 }
   0x8   : > { %s264_s25 = ssub.s32 %s1436_s20, %s1535_s23  ;;  %p277_p0 = scmp.ne.s32.totalorder %s1432_s19, %s1428_s18 }
   0x9   : > { %p265_p1 = scmp.eq.s32.totalorder %s264_s25, 0  ;;  %p278_p2 = scmp.eq.s32.totalorder %s1531_s21, 1 }
   0xa   : > { %p283_p3 = scmp.ne.s32.totalorder %s1428_s18, %s1424_s17  ;;  %p284_p4 = scmp.eq.s32.totalorder %s1170_s22, 1 }
   0xb   : > { %s1546_s26 = scalar_select %p265_p1, %s1432_s19, %s267_s24  }
   0xc   : > { %p1548_p5 = por %p278_p2, %p277_p0  ;;  %p1552_p6 = por %p284_p4, %p283_p3 }
   0xd   : > { %p1173_p7 = scmp.ge.s32.totalorder %s1436_s20, 1  ;;  %p339_p8 = scmp.lt.s32.totalorder %s1436_s20, 3 }
   0xf   : > { %p340_p9 = pnand %p1173_p7, %p339_p8 }
  0x10   : > { %p378_p10 = scmp.lt.s32.totalorder (!%p340_p9), %s1531_s21, 1  ;;  %s1808_s0 = sld [smem:[#allocation11_spill]] (!%p340_p9) }
  0x11   : > { %343 = sbr.rel (%p340_p9) target bundleno = 1605 (0x645), region = 64  ;;  %s1803_s15 = sand.u32 (!%p340_p9), 1, %s1428_s18  }
  0x12   : > { %s1574_s24 = sshll.u32 (!%p340_p9), %s1803_s15, 3  ;;  %s1809_s1 = sld [smem:[#allocation12_spill]] (!%p340_p9) }
  0x13   : > { %s1445_s15 = smov (!%p340_p9), 126   ;;  %s377_s25 = scalar_lea.vmem (!%p340_p9), [#allocation8], %s1574_s24 }
  0x16   : > { %s379_s29 = scalar_select %p378_p10, %s1531_s21, 1  ;;  %vm384_vm0 = vcmask 261120   ;;  %v404_v3 = vld [vmem:[%s1793_s2 + $0x18] sm:$0xff]  ;;  %v1442_v4 = vmov 0.0   ;;  %v403_v5 = vld [vmem:[%s1793_s2 + $0x10] sm:$0xff]  ;;  %vm1443_vm1 = vmmov 0  }
  0x17   : > { %1230 = vmatprep.subr.mxu0 %v1442_v4  ;;  %1238 = vmatprep.mubr.msk.f32.mxu0 %vm1443_vm1, %v1442_v4  ;;  %v402_v6 = vld [vmem:[%s1793_s2 + $0x8] sm:$0xff]  ;;  %v401_v7 = vld [vmem:[%s1793_s2] sm:$0xff]  ;;  %v556_v15 = vld [vmem:[%s1796_s5 + $0x38] sm:$0xff]  ;;  %vm557_vm2 = vcmask 523264   ;;  %vm643_vm3 = vcmask 1041408   ;;  %vm481_vm4 = vcmask 1042432  }
  0x18   : > { %s1175_s30 = sshll.u32 %s379_s29, 3  ;;  %1231 = vmatpush3.msra.mxu0 %v404_v3  ;;  %1241 = vmatprep.subr.mxu1 %v1442_v4  ;;  %v1176_v12 = vld [vmem:[%s1809_s1] ss:$0 sm:$0xff]  ;;  %v555_v16 = vld [vmem:[%s1796_s5 + $0x30] sm:$0xff]  ;;  %v554_v17 = vld [vmem:[%s1796_s5 + $0x28] sm:$0xff]  ;;  %746 = vst.msk [vmem:[#allocation7] sm:$0xff] %vm557_vm2, %v1442_v4 }
  0x19   : > { %s381_s14 = scalar_lea.vmem %s1808_s0, %s1175_s30  ;;  %1232 = vmatprep.subr.mxu0 %v1442_v4  ;;  %1257 = vmatprep.mubr.msk.f32.mxu1 %vm1443_vm1, %v1442_v4  ;;  %v553_v18 = vld [vmem:[%s1796_s5 + $0x20] sm:$0xff]  ;;  %v552_v19 = vld [vmem:[%s1796_s5 + $0x18] sm:$0xff]  ;;  %v551_v20 = vld [vmem:[%s1796_s5 + $0x10] sm:$0xff]  ;;  %747 = vst.msk [vmem:[#allocation7 + $0x8] sm:$0xff] %vm557_vm2, %v1442_v4  ;;  %vm506_vm5 = vcmask 1046528   ;;  %vm521_vm6 = vcmask 1045504  }
  0x1a   : > { %v1563_v0 = vld [vmem:[%s381_s14] sm:$0xff]  ;;  %1233 = vmatpush3.msra.mxu0 %v403_v5  ;;  %1242 = vmatpush3.msra.mxu1 %v556_v15  ;;  %v550_v21 = vld [vmem:[%s1796_s5 + $0x8] sm:$0xff]  ;;  %vm536_vm7 = vcmask 1044480   ;;  %vm639_vm8 = vcmask 15360   ;;  %s1444_s0 = smov 110   ;;  %vm740_vm9 = vcmask 130048  }
  0x1b   : > { %v383_v1 = vmul.f32 %v1563_v0, %v1563_v0  ;;  %1234 = vmatprep.subr.mxu0 %v1442_v4  ;;  %1243 = vmatprep.subr.mxu1 %v1442_v4  ;;  %v549_v22 = vld [vmem:[%s1796_s5] sm:$0xff]  ;;  %v749_v61 = vld [vmem:[%s1799_s8 + $0x8] sm:$0xff]  ;;  %s1683_s29 = smov 0  }
  0x1c   : > { %1235 = vmatpush3.msra.mxu0 %v402_v6  ;;  %1244 = vmatpush3.msra.mxu1 %v555_v16  ;;  %v631_v23 = vld [vmem:[%s1797_s6] sm:$0x3]  ;;  %v1181_v26 = vld [vmem:[%s1794_s3 + $0x2] ss:$0 sm:$0xff]  ;;  %v1182_v27 = vld [vmem:[%s1794_s3 + $0x3] ss:$0 sm:$0xff] }
  0x1d   : > { %v385_v2 = vsel %vm384_vm0, %v383_v1, 0.0  ;;  %1236 = vmatprep.subr.mxu0 %v1442_v4  ;;  %1245 = vmatprep.subr.mxu1 %v1442_v4  ;;  %v1180_v25 = vld [vmem:[%s1794_s3 + $0x1] ss:$0 sm:$0xff]  ;;  %v1178_v29 = vld [vmem:[%s1794_s3] ss:$0 sm:$0xff] }
  0x1e   : > { %386 = vadd.xlane.f32.xlu0 %v385_v2  ;;  %1237 = vmatpush3.msra.mxu0 %v401_v7  ;;  %v1179_v32 = vld [vmem:[%s1795_s4] ss:$0 sm:$0xff]  ;;  %v752_v63 = vmul.f32 1.442695, %v749_v61 }
  0x1f   : > { %1260 = vmatprep.subr.mxu0 %v1442_v4  ;;  %1246 = vmatpush3.msra.mxu1 %v554_v17  ;;  %v748_v60 = vld [vmem:[%s1799_s8] sm:$0xff] }
  0x20   : > { %1247 = vmatprep.subr.mxu1 %v1442_v4  ;;  %v750_v62 = vmul.f32 1.442695, %v748_v60 }
  0x21   : > { %1248 = vmatpush3.msra.mxu1 %v553_v18 }
  0x22   : > { %1249 = vmatprep.subr.mxu1 %v1442_v4 }
  0x23   : > { %1250 = vmatpush3.msra.mxu1 %v552_v19 }
  0x24   : > { %1251 = vmatprep.subr.mxu1 %v1442_v4 }
  0x25   : > { %1252 = vmatpush3.msra.mxu1 %v551_v20 }
  0x26   : > { %1253 = vmatprep.subr.mxu1 %v1442_v4 }
  0x27   : > { %1254 = vmatpush3.msra.mxu1 %v550_v21 }
  0x28   : > { %1255 = vmatprep.subr.mxu1 %v1442_v4 }
  0x29   : > { %1256 = vmatpush3.msra.mxu1 %v549_v22 }
  0xa7   : > { %v387_v8 = vpop.xlane.xlu0 %386 }
  0xa8   : > { %v389_v9 = vmul.f32 0.03125, %v387_v8  ;;  %v1185_v8 = vld [vmem:[%s1798_s7] ss:$0 sm:$0xff] }
  0xaa   : > { %v390_v10 = vadd.f32 1e-05, %v389_v9 }
  0xac   : > { %1350 = vrsqrt.f32 %v390_v10 }
  0xb9   : > { %v1351_v11 = vpop.eup %1350 }
  0xba   : > { %v392_v13 = vmul.f32 %v1351_v11, %v1563_v0 }
  0xbc   : > { %v400_v14 = vmul.f32 %v1176_v12, %v392_v13 }
  0xbe   : > { %1239 = vmatmul.mubr.msk.f32.vlgmr.msra.gmra.mxu0 %vm384_vm0, %v400_v14 }
  0xbf   : > { %1262 = vmatprep.mubr.msk.f32.mxu0 %vm1443_vm1, %v1442_v4  ;;  %1261 = vmatpush3.msk.msra.mxu0 %vm643_vm3, %v631_v23 }
 0x17e   : > { %v1640_v24 = vpop.f32.mrf.mxu0 }
 0x17f   : > { %v479_v28 = vrot.slane %v1640_v24, 5 }
 0x180   : > { %v1240_v30 = vpop.f32.mrf.mxu0 }
 0x181   : > { %v482_v31 = vsel %vm481_vm4, 0.0, %v479_v28  ;;  %v503_v33 = vmul.f32 %v1180_v25, %v479_v28  ;;  %v518_v34 = vmul.f32 %v1181_v26, %v479_v28  ;;  %v533_v35 = vmul.f32 %v1182_v27, %v479_v28 }
 0x182   : > { %v489_v36 = vmul.f32 %v1178_v29, %v482_v31  ;;  %v502_v37 = vmul.f32 %v1180_v25, %v482_v31  ;;  %v517_v38 = vmul.f32 %v1181_v26, %v482_v31  ;;  %v532_v39 = vmul.f32 %v1182_v27, %v482_v31 }
 0x183   : > { %v508_v40 = vrot.slane %v503_v33, 1  ;;  %v523_v44 = vrot.slane %v518_v34, 2  ;;  %v538_v47 = vrot.slane %v533_v35, 3 }
 0x184   : > { %v496_v41 = vadd.f32 %v1179_v32, %v489_v36  ;;  %v507_v42 = vrot.slane %v502_v37, 1  ;;  %v522_v43 = vrot.slane %v517_v38, 2  ;;  %v537_v46 = vrot.slane %v532_v39, 3 }
 0x186   : > { %v509_v45 = vsel %vm506_vm5, %v507_v42, %v508_v40  ;;  %v524_v49 = vsel %vm521_vm6, %v522_v43, %v523_v44  ;;  %v539_v51 = vsel %vm536_vm7, %v537_v46, %v538_v47 }
 0x187   : > { %v511_v48 = vadd.f32 %v509_v45, %v496_v41 }
 0x189   : > { %v526_v50 = vadd.f32 %v524_v49, %v511_v48 }
 0x18b   : > { %v541_v52 = vadd.f32 %v539_v51, %v526_v50 }
 0x18d   : > { %v1183_v53 = vmul.f32 -1.442695, %v541_v52 }
 0x18f   : > { %1352 = vpow2.f32 %v1183_v53 }
 0x19c   : > { %v1353_v54 = vpop.eup %1352 }
 0x19d   : > { %v545_v55 = vadd.f32 1.0, %v1353_v54 }
 0x19f   : > { %1354 = vrcp.f32 %v545_v55 }
 0x1a0   : > { %1356 = vpow2.f32 %v750_v62 }
 0x1a1   : > { %1358 = vpow2.f32 %v752_v63 }
 0x1ac   : > { %v1355_v56 = vpop.eup %1354 }
 0x1ad   : > { %v1658_v57 = vmul.f32 %v1355_v56, %v541_v52  ;;  %v1670_v1 = vpop.eup %1356 }
 0x1ae   : > { %v1672_v2 = vpop.eup %1358  ;;  %v754_v3 = vsub.f32 0.0, %v1670_v1 }
 0x1af   : > { %1258 = vmatmul.mubr.msk.f32.vlgmr.msra.gmra.mxu1 %vm557_vm2, %v1658_v57  ;;  %736 = vst.msk [vmem:[#allocation3] sm:$0xff] %vm557_vm2, %v1658_v57  ;;  %v755_v5 = vsub.f32 0.0, %v1672_v2 }
 0x26f   : > { %v627_v58 = vpop.f32.mrf.mxu1 }
 0x270   : > { %742 = vrot.lane.b32.xlu1 %v627_v58, %s1444_s0  ;;  %737 = vrot.lane.b32.xlu0 %v627_v58, %s1445_s15 }
 0x271   : > { %1263 = vmatmul.mubr.msk.f32.vlgmr.msra.gmra.mxu0 %vm639_vm8, %v627_v58  ;;  %v1259_v59 = vpop.f32.mrf.mxu1 }
 0x2e2   : > { %v743_v6 = vpop.permute.xlu1 %742  ;;  %v738_v7 = vpop.permute.xlu0 %737 }
 0x2e3   : > { %745 = vst.msk [vmem:[#allocation5] sm:$0xff] %vm740_vm9, %v743_v6  ;;  %741 = vst.msk [vmem:[#allocation4] sm:$0xff] %vm740_vm9, %v738_v7 }
 0x331   : > { %v713_v9 = vpop.f32.mrf.mxu0 }
 0x332   : > { %v714_v10 = vadd.f32 %v1185_v8, %v713_v9 }
 0x333   : > { %v1264_v11 = vpop.f32.mrf.mxu0 }
 0x334   : > { %v720_v12 = vand.u32 2147483647, %v714_v10  ;;  %v717_v23 = vmax.f32 %v714_v10, 0.0  ;;  %vm718_vm11 = vcmp.ne.f32.partialorder %v714_v10, %v714_v10 }
 0x336   : > { %v721_v13 = vsub.f32 0.0, %v720_v12 }
 0x338   : > { %v722_v14 = vmul.f32 1.442695, %v721_v13 }
 0x33a   : > { %1360 = vpow2.f32 %v722_v14 }
 0x347   : > { %v1361_v15 = vpop.eup %1360 }
 0x348   : > { %v724_v16 = vadd.f32 1.0, %v1361_v15  ;;  %v727_v17 = vmul.f32 -0.5, %v1361_v15  ;;  %v730_v19 = vand.u32 2147483647, %v1361_v15 }
 0x34a   : > { %1362 = vlog2.f32 %v724_v16  ;;  %v728_v18 = vadd.f32 1.0, %v727_v17  ;;  %vm731_vm10 = vcmp.lt.f32.partialorder %v730_v19, 0.0004427343 }
 0x34c   : > { %v729_v22 = vmul.f32 %v1361_v15, %v728_v18 }
 0x357   : > { %v1363_v20 = vpop.eup %1362 }
 0x358   : > { %v726_v21 = vmul.f32 0.6931472, %v1363_v20 }
 0x35a   : > { %v732_v25 = vsel %vm731_vm10, %v729_v22, %v726_v21 }
 0x35b   : > { %v733_v26 = vadd.f32 %v732_v25, %v717_v23 }
 0x35d   : > { %v734_v27 = vsel %vm718_vm11, %v714_v10, %v733_v26 }
 0x35e   : > { %735 = vst.msk [vmem:[#allocation2] sm:$0xff] %vm557_vm2, %v734_v27 }
 0x35f LB: >> { %s766_s0 = scalar_lea.vmem [#allocation4], %s1440_s29  ;;  %s762_s15 = scalar_lea.vmem [#allocation2], %s1440_s29  ;;  %vm820_vm12 = vcmask 1040384   ;;  %vm813_vm13 = vcmask 7168   ;;  %v1446_v34 = vmov 0.0   ;;  %vm1447_vm14 = vmmov 0   ;;  %s1440_s29 = sphi %s1683_s29, %s761_s29  }
 0x360   : >> { %v767_v28 = vld [vmem:[%s766_s0] sm:$0x1]  ;;  %s764_s30 = scalar_lea.vmem [#allocation3], %s1440_s29  ;;  %1270 = vmatprep.subr.mxu1 %v1446_v34  ;;  %1274 = vmatprep.mubr.msk.f32.mxu1 %vm1447_vm14, %v1446_v34  ;;  %v770_v35 = vlaneseq  ;;  %v900_v44 = vld [vmem:[#allocation7 + $0x8] sm:$0xff]  ;;  %v899_v46 = vld [vmem:[#allocation7] sm:$0xff]  ;;  %s768_s12 = scalar_lea.vmem [#allocation5], %s1440_s29 }
 0x361   : >> { %781 = vxpose.xlu0.b32.start.end [1/1] (short) (narrow) %v767_v28, 16  ;;  %v765_v30 = vld [vmem:[%s764_s30] sm:$0x1]  ;;  %vm981_vm15 = vcmask 516096   ;;  %s980_s13 = scalar_lea.vmem [#allocation6], %s1440_s29  ;;  %s761_s29 = sadd.s32 1, %s1440_s29  }
 0x362   : >> { %v771_v36 = vshrl.u32 %v770_v35, 7  ;;  %v769_v53 = vld [vmem:[%s768_s12] sm:$0x1]  ;;  %p758_p11 = scmp.ge.s32.totalorder %s761_s29, 8  }
 0x363   : > { %v1193_v56 = vmul.f32 (%p758_p11), -1.442695, %v1640_v24  ;;  %v1012_v58 = vld [vmem:[%s1801_s10 + $0x38] sm:$0xff] (%p758_p11)  ;;  %v1011_v59 = vld [vmem:[%s1801_s10 + $0x30] sm:$0xff] (%p758_p11)  ;;  %v1010_v60 = vld [vmem:[%s1801_s10 + $0x28] sm:$0xff] (%p758_p11)  ;;  %s1448_s12 = smov (%p758_p11), 64  }
 0x364   : >> { %v772_v37 = vsub.s32 0, %v771_v36  ;;  %v1009_v61 = vld [vmem:[%s1801_s10 + $0x20] sm:$0xff] (%p758_p11)  ;;  %v1008_v62 = vld [vmem:[%s1801_s10 + $0x18] sm:$0xff] (%p758_p11)  ;;  %v1007_v63 = vld [vmem:[%s1801_s10 + $0x10] sm:$0xff] (%p758_p11)  ;;  %s1196_s16 = sshll.u32 (%p758_p11), %s1531_s21, 7  ;;  %s1101_s22 = sshll.u32 (%p758_p11), %s377_s25, 4  ;;  %s1102_s22 = int_to_ptr.vmem [resolvable:$true] %s1101_s22 }
 0x365   : >> { %v763_v29 = vld [vmem:[%s762_s15] sm:$0x1]  ;;  %s1751_s15 = scalar_lea.hbm (%p758_p11), %s1802_s11, %s1196_s16  ;;  %s1810_s30 = sand.u32 (%p758_p11), 1, %s1428_s18  }
 0x366   : >> { %v780_v31 = vmul.f32 %v765_v30, %v763_v29  ;;  %v773_v38 = vrot.slane %v763_v29, %v772_v37  ;;  %v1192_v8 = vld [vmem:[%s1800_s9] ss:$0 sm:$0xff] (%p758_p11)  ;;  %s1449_s21 = smov (%p758_p11), [#allocation8]  }
 0x367   : > { %v991_v9 = vmul.f32 (%p758_p11), %v1192_v8, %v1658_v57  ;;  %s1376_s14 = sshll.u32 (%p758_p11), %s1449_s21, 4  ;;  %s1377_s14 = int_to_ptr.vmem [resolvable:$false] %s1376_s14 }
 0x368   : >> { %1265 = vmatprep.subr.msk.mxu0 %vm820_vm12, %v780_v31  ;;  %v775_v39 = vmul.f32 %v773_v38, %v755_v5  ;;  %v774_v40 = vmul.f32 %v773_v38, %v754_v3  ;;  %v1006_v3 = vld [vmem:[%s1801_s10 + $0x8] sm:$0xff] (%p758_p11)  ;;  %v1005_v5 = vld [vmem:[%s1801_s10] sm:$0xff] (%p758_p11)  ;;  %s1378_s1 = scalar_lea.vmem (%p758_p11), %s1377_s14, 256  ;;  %p1379_p1 = scmp.lt.s32.totalorder (%p758_p11), %s1102_s22, %s1377_s14 }
 0x369   : >> { %1266 = vmatpush3.msk.msra.mxu0 %vm820_vm12, %v780_v31 }
 0x36a   : >> { %v778_v41 = vmul.f32 1.442695, %v775_v39  ;;  %v776_v42 = vmul.f32 1.442695, %v774_v40  ;;  %1277 = vmatprep.subr.mxu0 (%p758_p11), %v1442_v4 }
 0x36c   : >> { %1364 = vpow2.f32 %v778_v41 }
 0x36d   : >> { %1366 = vpow2.f32 %v776_v42 }
 0x36e   : > { %1368 = vpow2.f32 (%p758_p11), %v1193_v56 }
 0x379   : >> { %v1365_v43 = vpop.eup %1364 }
 0x37a   : >> { %v1367_v45 = vpop.eup %1366  ;;  %v902_v47 = vmul.f32 %v1365_v43, %v900_v44 }
 0x37b   : >> { %v901_v48 = vmul.f32 %v1367_v45, %v899_v46  ;;  %v1369_v1 = vpop.eup (%p758_p11), %1368 }
 0x37c   : > { %v996_v2 = vadd.f32 (%p758_p11), 1.0, %v1369_v1 }
 0x37e   : > { %1370 = vrcp.f32 (%p758_p11), %v996_v2 }
 0x38b   : > { %v1371_v6 = vpop.eup (%p758_p11), %1370 }
 0x38c   : > { %v999_v7 = vmul.f32 (%p758_p11), %v1371_v6, %v1640_v24 }
 0x38e   : > { %1001 = vrot.lane.b32.xlu0 (%p758_p11), %v999_v7, %s1448_s12  ;;  %s1088_s12 = scalar_lea.sflag (%p758_p11), [#allocation9], %s1810_s30 }
 0x3dd   : >> { %v797_v32 = vpop.trf.xlu0 }
 0x3de   : >> { %1267 = vmatprep.mubr.msk.f32.mxu0 %vm813_vm13, %v797_v32 }
 0x3e1   : >> { %v798_v33 = vpop.trf.xlu0 }
 0x3e2   : >> { %1268 = vmatmul.mubr.msk.f32.vlgmr.msra.gmra.mxu0 %vm813_vm13, %v798_v33 }
 0x3e3   : > { %1293 = vmatprep.mubr.msk.f32.mxu0 (%p758_p11), %vm1443_vm1, %v1442_v4  ;;  %1278 = vmatpush3.msra.mxu0 (%p758_p11), %v1012_v58 }
 0x3e4   : > { %1279 = vmatprep.subr.mxu0 (%p758_p11), %v1442_v4 }
 0x3e5   : > { %1280 = vmatpush3.msra.mxu0 (%p758_p11), %v1011_v59 }
 0x3e6   : > { %1281 = vmatprep.subr.mxu0 (%p758_p11), %v1442_v4 }
 0x3e7   : > { %1282 = vmatpush3.msra.mxu0 (%p758_p11), %v1010_v60 }
 0x3e8   : > { %1283 = vmatprep.subr.mxu0 (%p758_p11), %v1442_v4 }
 0x3e9   : > { %1284 = vmatpush3.msra.mxu0 (%p758_p11), %v1009_v61 }
 0x3ea   : > { %1285 = vmatprep.subr.mxu0 (%p758_p11), %v1442_v4 }
 0x3eb   : > { %1286 = vmatpush3.msra.mxu0 (%p758_p11), %v1008_v62 }
 0x3ec   : > { %1287 = vmatprep.subr.mxu0 (%p758_p11), %v1442_v4 }
 0x3ed   : > { %1288 = vmatpush3.msra.mxu0 (%p758_p11), %v1007_v63 }
 0x3ee   : > { %1289 = vmatprep.subr.mxu0 (%p758_p11), %v1442_v4 }
 0x3ef   : > { %1290 = vmatpush3.msra.mxu0 (%p758_p11), %v1006_v3 }
 0x3f0   : > { %1291 = vmatprep.subr.mxu0 (%p758_p11), %v1442_v4 }
 0x3f1   : > { %1292 = vmatpush3.msra.mxu0 (%p758_p11), %v1005_v5 }
 0x400   : > { %v1002_v11 = vpop.permute.xlu0 (%p758_p11), %1001 }
 0x4a2   : >> { %v1269_v49 = vpop.f32.mrf.mxu0 }
 0x4a3   : >> { %v904_v50 = vadd.f32 %v1269_v49, %v902_v47 }
 0x4a4   : >> { %v890_v51 = vpop.f32.mrf.mxu0 }
 0x4a5   : >> { %906 = vst.msk [vmem:[#allocation7 + $0x8] sm:$0xff] %vm557_vm2, %v904_v50  ;;  %v903_v52 = vadd.f32 %v901_v48, %v890_v51  ;;  %1271 = vmatpush3.msra.mxu1 %v904_v50 }
 0x4a6   : >> { %1272 = vmatprep.subr.mxu1 %v1446_v34 }
 0x4a7   : >> { %905 = vst.msk [vmem:[#allocation7] sm:$0xff] %vm557_vm2, %v903_v52  ;;  %1273 = vmatpush3.msra.mxu1 %v903_v52 }
 0x4a8   : >> { %1275 = vmatmul.mubr.msk.f32.vlgmr.msra.gmra.mxu1 %vm740_vm9, %v769_v53 }
 0x566   : > { %760 = sbr.rel (!%p758_p11) target bundleno = 863 (0x35f), region = 111 }
 0x568   : >> { %v976_v54 = vpop.f32.mrf.mxu1 }
 0x569   : >> { %982 = vst.msk [vmem:[%s980_s13] sm:$0x1] %vm981_vm15, %v976_v54  ;;  %s1372_s13 = scalar_lea.vmem (%p758_p11), %s1102_s22, 128 }
 0x56a   : >> { %v1276_v55 = vpop.f32.mrf.mxu1  ;;  %p1373_p12 = scmp.ne.s32.totalorder (%p758_p11), %s1102_s22, %s1372_s13  ;;  %p1380_p2 = scmp.lt.s32.totalorder (%p758_p11), %s1378_s1, %s1372_s13 }
 0x56c   : > { %p1374_p13 = pnand %p1373_p12, %p1548_p5  ;;  %p1381_p3 = por %p1380_p2, %p1379_p1 }
 0x56e   : > { %p1375_p0 = pneg %p1374_p13 }
 0x570   : > { %v983_v10 = vld [vmem:[#allocation6] sm:$0xff]  ;;  %p1382_p4 = pnand %p1381_p3, %p1375_p0 }
 0x571   : > { %v992_v4 = vadd.f32 %v991_v9, %v983_v10 }
 0x573   : > { %v1004_v12 = vmul.f32 %v1002_v11, %v992_v4 }
 0x575   : > { %1294 = vmatmul.mubr.msk.f32.vlgmr.msra.gmra.mxu0 %vm557_vm2, %v1004_v12 }
 0x635   : > { %v1082_v24 = vpop.f32.mrf.mxu0 }
 0x636   : > { %v1083_v13 = vadd.f32 %v1082_v24, %v1563_v0 }
 0x637   : > { %v1295_v57 = vpop.f32.mrf.mxu0 }
 0x638   : > { %1086 = vst.msk [vmem:[%s377_s25] sm:$0xff] %vm384_vm0, %v1083_v13 }
 0x639   : > { %1385 = shalt.err (!%p1382_p4)
}
 0x63a   : > { %s1386_s24 = scalar_lea.hbm %s1751_s15, 128  ;;  %s1390_s0 = scalar_lea.hbm %s1802_s11, 256 }
 0x63b   : > { %p1387_p7 = scmp.ne.s32.totalorder %s1751_s15, %s1386_s24  ;;  %p1391_p10 = scmp.lt.s32.totalorder %s1751_s15, %s1802_s11 }
 0x63c   : > { %p1392_p11 = scmp.lt.s32.totalorder %s1390_s0, %s1386_s24 }
 0x63d   : > { %p1388_p8 = pnand %p1387_p7, %p1548_p5 }
 0x63e   : > { %p1393_p12 = por %p1392_p11, %p1391_p10 }
 0x63f   : > { %p1389_p9 = pneg %p1388_p8 }
 0x641   : > { %p1394_p13 = pnand %p1393_p12, %p1389_p9 }
 0x643   : > { %1397 = shalt.err (!%p1394_p13)
}
 0x644   : > { %1296 = dma.vmem_to_hbm [thread:$0]  (%p1548_p5), %s1102_s22, 128, %s1751_s15, %s1088_s12  }
 0x645 PF: > { %p1302_p0 = scmp.ge.s32.totalorder %s1436_s20, 2  ;;  %s1113_s1 = sand.u32 1, %s1424_s17  }
 0x646   : > { %s1114_s13 = scalar_lea.sflag [#allocation9], %s1113_s1 }
 0x647   : > { %p1299_p1 = pnand %p1302_p0, %p1552_p6 }
 0x649   : > { %p1300_p2 = pneg %p1299_p1 }
 0x64b   : > { %1419 = dma.done.wait (%p1300_p2), %s1114_s13, 128  }
 0x64c   : > { %1421 = vsyncadd (%p1300_p2), %s1114_s13, 4294967168  ;;  %p21_p3 = scmp.ge.s32.totalorder %s1535_s23, 4   ;;  %s1811_s17 = smov %s1428_s18 }
 0x64d   : > { %s1812_s18 = smov %s1432_s19  ;;  %s1813_s19 = smov %s1546_s26 }
 0x64e   : > { %s1814_s20 = smov %s1535_s23  ;;  %23 = sbr.rel (!%p21_p3) target bundleno = 6 (0x6), region = 122 }
 0x653   :  { %1119 = vsyncpa [#allocation9], 1 }
 0x654   :  { %1121 = vsyncpa [#allocation9 + $0x1], 1 }

</bundles_post_ra>
